<compile_context>
chip_gen: v7x
topology: tpu7x:2x2x1
jax: 0.10.0
libtpu: 0.0.40
codegen_flags: <defaults>
</compile_context>

<pallas_src>
import jax
import jax.numpy as jnp
from jax.experimental import pallas as pl
from jax.experimental.pallas import tpu as pltpu


def _planar_flow_kernel(zT_ref, wT_ref, uhT_ref, bT_ref, wuhT_ref, xT_ref, ld_ref):
    """One batch tile of the full flow stack, batch on the lane axis.

    zT_ref  : (D, TB)  input samples, transposed (batch on lanes)
    wT_ref  : (D, L)   per-layer w vectors (columns)
    uhT_ref : (D, L)   per-layer u_hat vectors (columns, precomputed in wrapper)
    bT_ref  : (1, L)   per-layer biases
    wuhT_ref: (1, L)   per-layer w^T u_hat (precomputed in wrapper)
    xT_ref  : (D, TB)  transformed samples (output, transposed)
    ld_ref  : (1, TB)  summed log|det Jacobian| (output, lane-dense)
    """
    zT = zT_ref[...].astype(jnp.float32)       # (D, TB)
    wT = wT_ref[...].astype(jnp.float32)       # (D, L)
    uhT = uhT_ref[...].astype(jnp.float32)     # (D, L)
    bT = bT_ref[...].astype(jnp.float32)       # (1, L)
    wuh = wuhT_ref[...].astype(jnp.float32)    # (1, L)

    n_flows = wT.shape[1]
    tb = zT.shape[1]

    log_det = jnp.zeros((1, tb), dtype=jnp.float32)
    det_prod = jnp.ones((1, tb), dtype=jnp.float32)

    # n_flows is a small compile-time constant -> static unrolled loop is fine.
    # TODO(synk): for L > ~16 switch to lax.fori_loop(unroll=2-4) with pl.ds
    #             column slices (and (L,D) sublane-row param layout) to bound
    #             vreg live ranges; for D >= ~128 adopt the MXU reformulation
    #             (A = z0 @ W^T, C = W @ U_hat^T hoisted, (1,TB) recurrence,
    #             final x = z0 + H @ U_hat); for D < 8 consider packing two
    #             batch sub-tiles into the 8 sublanes if VPU/XLU ever binds.
    for l in range(n_flows):
        w_col = wT[:, l:l + 1]                                    # (D, 1)
        uh_col = uhT[:, l:l + 1]                                  # (D, 1)

        # lin = w^T z + b  -> sublane reduce over D, lane-dense (1, TB)
        lin = jnp.sum(zT * w_col, axis=0, keepdims=True) + bT[:, l:l + 1]
        h = jnp.tanh(lin)                                         # (1, TB)

        # f(z) = z + u_hat * h  (broadcast (D,1) * (1,TB))
        zT = zT + uh_col * h                                      # (D, TB)

        # |det J| = |1 + (1 - h^2) * (w^T u_hat)| ; accumulate as a product and
        # flush through a single log every 8 layers (EUP relief + underflow guard).
        det = 1.0 + (1.0 - h * h) * wuh[:, l:l + 1]               # (1, TB)
        det_prod = det_prod * jnp.abs(det)
        if (l % 8 == 7) or (l == n_flows - 1):
            log_det = log_det + jnp.log(det_prod + 1e-8)
            if l != n_flows - 1:
                det_prod = jnp.ones((1, tb), dtype=jnp.float32)

    xT_ref[...] = zT.astype(xT_ref.dtype)
    ld_ref[...] = log_det.astype(ld_ref.dtype)


def _choose_batch_tile(batch, dim, max_tile=None):
    """Pick a lane-dense batch tile that amortizes step overhead yet fits VMEM.

    Per-step double-buffered HBM<->VMEM traffic ~= 16 * TB * D bytes
    (zT in + xT out, x2 buffers).  Budget <= ~8 MiB keeps ample headroom even
    under v5e's 16 MiB default scoped VMEM, while letting TB reach 32768 lanes
    at tiny D (block ~512 KiB at D=4) to amortize the ~0.35 us per-step cost.
    """
    tb = (1 << 19) // max(dim, 1)
    tb = max(128, min(32768, tb))
    if max_tile is not None:
        tb = min(tb, max(128, max_tile))
    tb = (tb // 128) * 128
    if batch <= tb:
        return batch                 # single tile: block dims == full dims
    return tb


def _prepare_params(u, w, b):
    """z-independent parameter math, done once in the wrapper (tiny XLA op)."""
    u = jnp.asarray(u, jnp.float32)                    # (L, D)
    w = jnp.asarray(w, jnp.float32)                    # (L, D)
    b = jnp.asarray(b, jnp.float32).reshape(1, -1)     # (1, L)
    wu = jnp.sum(w * u, axis=1)                        # (L,)   w^T u
    m_wu = jax.nn.softplus(wu) - 1.0
    w_norm_sq = jnp.sum(w * w, axis=1)                 # (L,)   ||w||^2
    u_hat = u + ((m_wu - wu) / (w_norm_sq + 1e-8))[:, None] * w    # (L, D)
    wu_hat = jnp.sum(w * u_hat, axis=1).reshape(1, -1)             # (1, L)
    return w.T, u_hat.T, b, wu_hat                     # (D,L), (D,L), (1,L), (1,L)


def planar_flow_stack_t(zT, u, w, b, max_tile=None):
    """Lane-dense native entry point: zT (D, B) -> (xT (D, B), log_det (B,)).

    Callers that can keep batch-on-lanes avoid any wrapper transpose HBM passes.
    """
    D, B = zT.shape
    wT, uhT, bT, wuhT = _prepare_params(u, w, b)
    L = wT.shape[1]

    TB = _choose_batch_tile(B, D, max_tile)
    grid = (pl.cdiv(B, TB),)   # ragged last block: OOB lanes computed, never stored

    xT, ld = pl.pallas_call(
        _planar_flow_kernel,
        out_shape=(
            jax.ShapeDtypeStruct((D, B), jnp.float32),
            jax.ShapeDtypeStruct((1, B), jnp.float32),
        ),
        grid=grid,
        in_specs=[
            pl.BlockSpec((D, TB), lambda i: (0, i)),   # z^T: tile the batch lanes
            pl.BlockSpec((D, L), lambda i: (0, 0)),    # params stay resident
            pl.BlockSpec((D, L), lambda i: (0, 0)),
            pl.BlockSpec((1, L), lambda i: (0, 0)),
            pl.BlockSpec((1, L), lambda i: (0, 0)),
        ],
        out_specs=(
            pl.BlockSpec((D, TB), lambda i: (0, i)),
            pl.BlockSpec((1, TB), lambda i: (0, i)),
        ),
        compiler_params=pltpu.CompilerParams(
            # Batch tiles are independent; "parallel" lets megacore split them.
            # TODO(synk): on v7x confirm 2-TC sharding in xprof; if one core,
            #             switch to pltpu.CORE_PARALLEL.
            dimension_semantics=("parallel",),
            vmem_limit_bytes=32 * 1024 * 1024,
        ),
    )(jnp.asarray(zT, jnp.float32), wT, uhT, bT, wuhT)

    return xT, ld[0]


def normalizing_flow_forward(z, u, w, b, max_tile=None):
    """NormalizingFlow.forward: z (B, D) -> (x (B, D), log_det_jacobian (B,)).

    Module-compatible (B, D) interface; the transposes here are wrapper layout
    plumbing only (cheap at small D).  Prefer planar_flow_stack_t for a
    transpose-free lane-dense path.
    """
    zT = jnp.asarray(z, jnp.float32).T                 # (D, B)
    xT, log_det = planar_flow_stack_t(zT, u, w, b, max_tile=max_tile)
    return xT.T, log_det


def _reference_forward(z, u, w, b):
    """Pure-JAX reference for correctness checking."""
    z = z.astype(jnp.float32)
    log_det = jnp.zeros((z.shape[0],), jnp.float32)
    for l in range(u.shape[0]):
        ul = u[l]
        wl = w[l]
        bl = b[l, 0]
        wu = jnp.dot(wl, ul)
        m_wu = -1.0 + jax.nn.softplus(wu)
        u_hat = ul + (m_wu - wu) * wl / (jnp.dot(wl, wl) + 1e-8)
        lin = z @ wl + bl
        h = jnp.tanh(lin)
        hp = 1.0 - h * h
        z = z + u_hat[None, :] * h[:, None]
        det = 1.0 + hp * jnp.dot(wl, u_hat)
        log_det = log_det + jnp.log(jnp.abs(det) + 1e-8)
    return z, log_det


if __name__ == "__main__":
    dim = 4
    n_flows = 6
    batch = 8

    key = jax.random.PRNGKey(0)
    k_z, k_u, k_w, k_b = jax.random.split(key, 4)

    # Base samples from a standard normal (what the PyTorch forward receives).
    z = jax.random.normal(k_z, (batch, dim), dtype=jnp.float32)

    # Deterministic per-layer parameters (shapes implied by PlanarFlow(dim)).
    u = 0.1 * jax.random.normal(k_u, (n_flows, dim), dtype=jnp.float32)
    w = 0.1 * jax.random.normal(k_w, (n_flows, dim), dtype=jnp.float32)
    b = 0.1 * jax.random.normal(k_b, (n_flows, 1), dtype=jnp.float32)

    # Small single-tile case (module-compatible (B, D) interface).
    x, log_det = normalizing_flow_forward(z, u, w, b)
    jax.block_until_ready((x, log_det))
    x_ref, ld_ref = _reference_forward(z, u, w, b)
    assert x.shape == (batch, dim) and log_det.shape == (batch,)
    assert jnp.allclose(x, x_ref, atol=1e-5, rtol=1e-4)
    assert jnp.allclose(log_det, ld_ref, atol=1e-5, rtol=1e-4)

    # Ragged multi-tile grid, no wrapper-side padding: 300 samples -> 3 tiles of 128,
    # last tile partially out of bounds (computed on garbage lanes, never stored).
    batch2 = 300
    z2 = jax.random.normal(jax.random.PRNGKey(1), (batch2, dim), dtype=jnp.float32)
    x2, ld2 = normalizing_flow_forward(z2, u, w, b, max_tile=128)
    jax.block_until_ready((x2, ld2))
    x2_ref, ld2_ref = _reference_forward(z2, u, w, b)
    assert x2.shape == (batch2, dim) and ld2.shape == (batch2,)
    assert jnp.allclose(x2, x2_ref, atol=1e-5, rtol=1e-4)
    assert jnp.allclose(ld2, ld2_ref, atol=1e-5, rtol=1e-4)

    # Lane-dense native path (no wrapper transposes at all).
    z3T = jnp.asarray(z2, jnp.float32).T
    x3T, ld3 = planar_flow_stack_t(z3T, u, w, b)
    jax.block_until_ready((x3T, ld3))
    assert jnp.allclose(x3T.T, x2_ref, atol=1e-5, rtol=1e-4)
    assert jnp.allclose(ld3, ld2_ref, atol=1e-5, rtol=1e-4)

    # TODO(synk): sample()/log_prob()/inverse() are host-side conveniences (base-dist
    # sampling, iterative inversion) and are not part of the kernel hot path.
    print("KERNEL_OK")
</pallas_src>

<mosaic_0001>
module attributes {stable_mosaic.version = 11 : i64} {
  func.func @_planar_flow_kernel(%arg0: i32, %arg1: memref<4x8xf32, #tpu.memory_space<vmem>>, %arg2: memref<4x6xf32, #tpu.memory_space<vmem>>, %arg3: memref<4x6xf32, #tpu.memory_space<vmem>>, %arg4: memref<1x6xf32, #tpu.memory_space<vmem>>, %arg5: memref<1x6xf32, #tpu.memory_space<vmem>>, %arg6: memref<4x8xf32, #tpu.memory_space<vmem>>, %arg7: memref<1x8xf32, #tpu.memory_space<vmem>>) attributes {dimension_semantics = [#tpu.dimension_semantics<parallel>], iteration_bounds = array<i64: 1>, scalar_prefetch = 0 : i64, scratch_operands = 0 : i64, tpu.core_type = #tpu.core_type<tc>, window_params = [{transform_indices = @transform_0, window_bounds = array<i64: 4, 8>}, {pipeline_mode = #tpu.pipeline_mode<synchronous>, transform_indices = @transform_1, window_bounds = array<i64: 4, 6>}, {pipeline_mode = #tpu.pipeline_mode<synchronous>, transform_indices = @transform_2, window_bounds = array<i64: 4, 6>}, {pipeline_mode = #tpu.pipeline_mode<synchronous>, transform_indices = @transform_3, window_bounds = array<i64: 1, 6>}, {pipeline_mode = #tpu.pipeline_mode<synchronous>, transform_indices = @transform_4, window_bounds = array<i64: 1, 6>}, {transform_indices = @transform_5, window_bounds = array<i64: 4, 8>}, {transform_indices = @transform_6, window_bounds = array<i64: 1, 8>}]} {
    %c0 = arith.constant 0 : index
    %c0_0 = arith.constant 0 : index
    %0 = vector.load %arg1[%c0, %c0_0] : memref<4x8xf32, #tpu.memory_space<vmem>>, vector<4x8xf32>
    %c0_1 = arith.constant 0 : index
    %c0_2 = arith.constant 0 : index
    %1 = vector.load %arg2[%c0_1, %c0_2] : memref<4x6xf32, #tpu.memory_space<vmem>>, vector<4x6xf32>
    %c0_3 = arith.constant 0 : index
    %c0_4 = arith.constant 0 : index
    %2 = vector.load %arg3[%c0_3, %c0_4] : memref<4x6xf32, #tpu.memory_space<vmem>>, vector<4x6xf32>
    %c0_5 = arith.constant 0 : index
    %c0_6 = arith.constant 0 : index
    %3 = vector.load %arg4[%c0_5, %c0_6] : memref<1x6xf32, #tpu.memory_space<vmem>>, vector<1x6xf32>
    %c0_7 = arith.constant 0 : index
    %c0_8 = arith.constant 0 : index
    %4 = vector.load %arg5[%c0_7, %c0_8] : memref<1x6xf32, #tpu.memory_space<vmem>>, vector<1x6xf32>
    %cst = arith.constant 0.000000e+00 : f32
    %5 = vector.broadcast %cst : f32 to vector<1x8xf32>
    %cst_9 = arith.constant 1.000000e+00 : f32
    %6 = vector.broadcast %cst_9 : f32 to vector<1x8xf32>
    %7 = vector.extract_strided_slice %1 {offsets = [0, 0], sizes = [4, 1], strides = [1, 1]} : vector<4x6xf32> to vector<4x1xf32>
    %8 = vector.extract_strided_slice %2 {offsets = [0, 0], sizes = [4, 1], strides = [1, 1]} : vector<4x6xf32> to vector<4x1xf32>
    %9 = vector.broadcast %7 : vector<4x1xf32> to vector<4x8xf32>
    %10 = arith.mulf %0, %9 : vector<4x8xf32>
    %cst_10 = arith.constant dense<0.000000e+00> : vector<8xf32>
    %11 = vector.multi_reduction <add>, %10, %cst_10 [0] : vector<4x8xf32> to vector<8xf32>
    %12 = vector.shape_cast %11 : vector<8xf32> to vector<1x8xf32>
    %13 = vector.extract_strided_slice %3 {offsets = [0, 0], sizes = [1, 1], strides = [1, 1]} : vector<1x6xf32> to vector<1x1xf32>
    %14 = vector.broadcast %13 : vector<1x1xf32> to vector<1x8xf32>
    %15 = arith.addf %12, %14 : vector<1x8xf32>
    %16 = math.tanh %15 : vector<1x8xf32>
    %17 = vector.broadcast %8 : vector<4x1xf32> to vector<4x8xf32>
    %18 = vector.broadcast %16 : vector<1x8xf32> to vector<4x8xf32>
    %19 = arith.mulf %17, %18 : vector<4x8xf32>
    %20 = arith.addf %0, %19 : vector<4x8xf32>
    %21 = arith.mulf %16, %16 : vector<1x8xf32>
    %cst_11 = arith.constant 1.000000e+00 : f32
    %22 = vector.broadcast %cst_11 : f32 to vector<1x8xf32>
    %23 = arith.subf %22, %21 : vector<1x8xf32>
    %24 = vector.extract_strided_slice %4 {offsets = [0, 0], sizes = [1, 1], strides = [1, 1]} : vector<1x6xf32> to vector<1x1xf32>
    %25 = vector.broadcast %24 : vector<1x1xf32> to vector<1x8xf32>
    %26 = arith.mulf %23, %25 : vector<1x8xf32>
    %cst_12 = arith.constant 1.000000e+00 : f32
    %27 = vector.broadcast %cst_12 : f32 to vector<1x8xf32>
    %28 = arith.addf %27, %26 : vector<1x8xf32>
    %29 = math.absf %28 : vector<1x8xf32>
    %30 = arith.mulf %6, %29 : vector<1x8xf32>
    %31 = vector.extract_strided_slice %1 {offsets = [0, 1], sizes = [4, 1], strides = [1, 1]} : vector<4x6xf32> to vector<4x1xf32>
    %32 = vector.extract_strided_slice %2 {offsets = [0, 1], sizes = [4, 1], strides = [1, 1]} : vector<4x6xf32> to vector<4x1xf32>
    %33 = vector.broadcast %31 : vector<4x1xf32> to vector<4x8xf32>
    %34 = arith.mulf %20, %33 : vector<4x8xf32>
    %cst_13 = arith.constant dense<0.000000e+00> : vector<8xf32>
    %35 = vector.multi_reduction <add>, %34, %cst_13 [0] : vector<4x8xf32> to vector<8xf32>
    %36 = vector.shape_cast %35 : vector<8xf32> to vector<1x8xf32>
    %37 = vector.extract_strided_slice %3 {offsets = [0, 1], sizes = [1, 1], strides = [1, 1]} : vector<1x6xf32> to vector<1x1xf32>
    %38 = vector.broadcast %37 : vector<1x1xf32> to vector<1x8xf32>
    %39 = arith.addf %36, %38 : vector<1x8xf32>
    %40 = math.tanh %39 : vector<1x8xf32>
    %41 = vector.broadcast %32 : vector<4x1xf32> to vector<4x8xf32>
    %42 = vector.broadcast %40 : vector<1x8xf32> to vector<4x8xf32>
    %43 = arith.mulf %41, %42 : vector<4x8xf32>
    %44 = arith.addf %20, %43 : vector<4x8xf32>
    %45 = arith.mulf %40, %40 : vector<1x8xf32>
    %cst_14 = arith.constant 1.000000e+00 : f32
    %46 = vector.broadcast %cst_14 : f32 to vector<1x8xf32>
    %47 = arith.subf %46, %45 : vector<1x8xf32>
    %48 = vector.extract_strided_slice %4 {offsets = [0, 1], sizes = [1, 1], strides = [1, 1]} : vector<1x6xf32> to vector<1x1xf32>
    %49 = vector.broadcast %48 : vector<1x1xf32> to vector<1x8xf32>
    %50 = arith.mulf %47, %49 : vector<1x8xf32>
    %cst_15 = arith.constant 1.000000e+00 : f32
    %51 = vector.broadcast %cst_15 : f32 to vector<1x8xf32>
    %52 = arith.addf %51, %50 : vector<1x8xf32>
    %53 = math.absf %52 : vector<1x8xf32>
    %54 = arith.mulf %30, %53 : vector<1x8xf32>
    %55 = vector.extract_strided_slice %1 {offsets = [0, 2], sizes = [4, 1], strides = [1, 1]} : vector<4x6xf32> to vector<4x1xf32>
    %56 = vector.extract_strided_slice %2 {offsets = [0, 2], sizes = [4, 1], strides = [1, 1]} : vector<4x6xf32> to vector<4x1xf32>
    %57 = vector.broadcast %55 : vector<4x1xf32> to vector<4x8xf32>
    %58 = arith.mulf %44, %57 : vector<4x8xf32>
    %cst_16 = arith.constant dense<0.000000e+00> : vector<8xf32>
    %59 = vector.multi_reduction <add>, %58, %cst_16 [0] : vector<4x8xf32> to vector<8xf32>
    %60 = vector.shape_cast %59 : vector<8xf32> to vector<1x8xf32>
    %61 = vector.extract_strided_slice %3 {offsets = [0, 2], sizes = [1, 1], strides = [1, 1]} : vector<1x6xf32> to vector<1x1xf32>
    %62 = vector.broadcast %61 : vector<1x1xf32> to vector<1x8xf32>
    %63 = arith.addf %60, %62 : vector<1x8xf32>
    %64 = math.tanh %63 : vector<1x8xf32>
    %65 = vector.broadcast %56 : vector<4x1xf32> to vector<4x8xf32>
    %66 = vector.broadcast %64 : vector<1x8xf32> to vector<4x8xf32>
    %67 = arith.mulf %65, %66 : vector<4x8xf32>
    %68 = arith.addf %44, %67 : vector<4x8xf32>
    %69 = arith.mulf %64, %64 : vector<1x8xf32>
    %cst_17 = arith.constant 1.000000e+00 : f32
    %70 = vector.broadcast %cst_17 : f32 to vector<1x8xf32>
    %71 = arith.subf %70, %69 : vector<1x8xf32>
    %72 = vector.extract_strided_slice %4 {offsets = [0, 2], sizes = [1, 1], strides = [1, 1]} : vector<1x6xf32> to vector<1x1xf32>
    %73 = vector.broadcast %72 : vector<1x1xf32> to vector<1x8xf32>
    %74 = arith.mulf %71, %73 : vector<1x8xf32>
    %cst_18 = arith.constant 1.000000e+00 : f32
    %75 = vector.broadcast %cst_18 : f32 to vector<1x8xf32>
    %76 = arith.addf %75, %74 : vector<1x8xf32>
    %77 = math.absf %76 : vector<1x8xf32>
    %78 = arith.mulf %54, %77 : vector<1x8xf32>
    %79 = vector.extract_strided_slice %1 {offsets = [0, 3], sizes = [4, 1], strides = [1, 1]} : vector<4x6xf32> to vector<4x1xf32>
    %80 = vector.extract_strided_slice %2 {offsets = [0, 3], sizes = [4, 1], strides = [1, 1]} : vector<4x6xf32> to vector<4x1xf32>
    %81 = vector.broadcast %79 : vector<4x1xf32> to vector<4x8xf32>
    %82 = arith.mulf %68, %81 : vector<4x8xf32>
    %cst_19 = arith.constant dense<0.000000e+00> : vector<8xf32>
    %83 = vector.multi_reduction <add>, %82, %cst_19 [0] : vector<4x8xf32> to vector<8xf32>
    %84 = vector.shape_cast %83 : vector<8xf32> to vector<1x8xf32>
    %85 = vector.extract_strided_slice %3 {offsets = [0, 3], sizes = [1, 1], strides = [1, 1]} : vector<1x6xf32> to vector<1x1xf32>
    %86 = vector.broadcast %85 : vector<1x1xf32> to vector<1x8xf32>
    %87 = arith.addf %84, %86 : vector<1x8xf32>
    %88 = math.tanh %87 : vector<1x8xf32>
    %89 = vector.broadcast %80 : vector<4x1xf32> to vector<4x8xf32>
    %90 = vector.broadcast %88 : vector<1x8xf32> to vector<4x8xf32>
    %91 = arith.mulf %89, %90 : vector<4x8xf32>
    %92 = arith.addf %68, %91 : vector<4x8xf32>
    %93 = arith.mulf %88, %88 : vector<1x8xf32>
    %cst_20 = arith.constant 1.000000e+00 : f32
    %94 = vector.broadcast %cst_20 : f32 to vector<1x8xf32>
    %95 = arith.subf %94, %93 : vector<1x8xf32>
    %96 = vector.extract_strided_slice %4 {offsets = [0, 3], sizes = [1, 1], strides = [1, 1]} : vector<1x6xf32> to vector<1x1xf32>
    %97 = vector.broadcast %96 : vector<1x1xf32> to vector<1x8xf32>
    %98 = arith.mulf %95, %97 : vector<1x8xf32>
    %cst_21 = arith.constant 1.000000e+00 : f32
    %99 = vector.broadcast %cst_21 : f32 to vector<1x8xf32>
    %100 = arith.addf %99, %98 : vector<1x8xf32>
    %101 = math.absf %100 : vector<1x8xf32>
    %102 = arith.mulf %78, %101 : vector<1x8xf32>
    %103 = vector.extract_strided_slice %1 {offsets = [0, 4], sizes = [4, 1], strides = [1, 1]} : vector<4x6xf32> to vector<4x1xf32>
    %104 = vector.extract_strided_slice %2 {offsets = [0, 4], sizes = [4, 1], strides = [1, 1]} : vector<4x6xf32> to vector<4x1xf32>
    %105 = vector.broadcast %103 : vector<4x1xf32> to vector<4x8xf32>
    %106 = arith.mulf %92, %105 : vector<4x8xf32>
    %cst_22 = arith.constant dense<0.000000e+00> : vector<8xf32>
    %107 = vector.multi_reduction <add>, %106, %cst_22 [0] : vector<4x8xf32> to vector<8xf32>
    %108 = vector.shape_cast %107 : vector<8xf32> to vector<1x8xf32>
    %109 = vector.extract_strided_slice %3 {offsets = [0, 4], sizes = [1, 1], strides = [1, 1]} : vector<1x6xf32> to vector<1x1xf32>
    %110 = vector.broadcast %109 : vector<1x1xf32> to vector<1x8xf32>
    %111 = arith.addf %108, %110 : vector<1x8xf32>
    %112 = math.tanh %111 : vector<1x8xf32>
    %113 = vector.broadcast %104 : vector<4x1xf32> to vector<4x8xf32>
    %114 = vector.broadcast %112 : vector<1x8xf32> to vector<4x8xf32>
    %115 = arith.mulf %113, %114 : vector<4x8xf32>
    %116 = arith.addf %92, %115 : vector<4x8xf32>
    %117 = arith.mulf %112, %112 : vector<1x8xf32>
    %cst_23 = arith.constant 1.000000e+00 : f32
    %118 = vector.broadcast %cst_23 : f32 to vector<1x8xf32>
    %119 = arith.subf %118, %117 : vector<1x8xf32>
    %120 = vector.extract_strided_slice %4 {offsets = [0, 4], sizes = [1, 1], strides = [1, 1]} : vector<1x6xf32> to vector<1x1xf32>
    %121 = vector.broadcast %120 : vector<1x1xf32> to vector<1x8xf32>
    %122 = arith.mulf %119, %121 : vector<1x8xf32>
    %cst_24 = arith.constant 1.000000e+00 : f32
    %123 = vector.broadcast %cst_24 : f32 to vector<1x8xf32>
    %124 = arith.addf %123, %122 : vector<1x8xf32>
    %125 = math.absf %124 : vector<1x8xf32>
    %126 = arith.mulf %102, %125 : vector<1x8xf32>
    %127 = vector.extract_strided_slice %1 {offsets = [0, 5], sizes = [4, 1], strides = [1, 1]} : vector<4x6xf32> to vector<4x1xf32>
    %128 = vector.extract_strided_slice %2 {offsets = [0, 5], sizes = [4, 1], strides = [1, 1]} : vector<4x6xf32> to vector<4x1xf32>
    %129 = vector.broadcast %127 : vector<4x1xf32> to vector<4x8xf32>
    %130 = arith.mulf %116, %129 : vector<4x8xf32>
    %cst_25 = arith.constant dense<0.000000e+00> : vector<8xf32>
    %131 = vector.multi_reduction <add>, %130, %cst_25 [0] : vector<4x8xf32> to vector<8xf32>
    %132 = vector.shape_cast %131 : vector<8xf32> to vector<1x8xf32>
    %133 = vector.extract_strided_slice %3 {offsets = [0, 5], sizes = [1, 1], strides = [1, 1]} : vector<1x6xf32> to vector<1x1xf32>
    %134 = vector.broadcast %133 : vector<1x1xf32> to vector<1x8xf32>
    %135 = arith.addf %132, %134 : vector<1x8xf32>
    %136 = math.tanh %135 : vector<1x8xf32>
    %137 = vector.broadcast %128 : vector<4x1xf32> to vector<4x8xf32>
    %138 = vector.broadcast %136 : vector<1x8xf32> to vector<4x8xf32>
    %139 = arith.mulf %137, %138 : vector<4x8xf32>
    %140 = arith.addf %116, %139 : vector<4x8xf32>
    %141 = arith.mulf %136, %136 : vector<1x8xf32>
    %cst_26 = arith.constant 1.000000e+00 : f32
    %142 = vector.broadcast %cst_26 : f32 to vector<1x8xf32>
    %143 = arith.subf %142, %141 : vector<1x8xf32>
    %144 = vector.extract_strided_slice %4 {offsets = [0, 5], sizes = [1, 1], strides = [1, 1]} : vector<1x6xf32> to vector<1x1xf32>
    %145 = vector.broadcast %144 : vector<1x1xf32> to vector<1x8xf32>
    %146 = arith.mulf %143, %145 : vector<1x8xf32>
    %cst_27 = arith.constant 1.000000e+00 : f32
    %147 = vector.broadcast %cst_27 : f32 to vector<1x8xf32>
    %148 = arith.addf %147, %146 : vector<1x8xf32>
    %149 = math.absf %148 : vector<1x8xf32>
    %150 = arith.mulf %126, %149 : vector<1x8xf32>
    %cst_28 = arith.constant 9.99999993E-9 : f32
    %151 = vector.broadcast %cst_28 : f32 to vector<1x8xf32>
    %152 = arith.addf %150, %151 : vector<1x8xf32>
    %153 = math.log %152 : vector<1x8xf32>
    %154 = arith.addf %5, %153 : vector<1x8xf32>
    %c0_29 = arith.constant 0 : index
    %c0_30 = arith.constant 0 : index
    %155 = vector.load %arg6[%c0_29, %c0_30] : memref<4x8xf32, #tpu.memory_space<vmem>>, vector<4x8xf32>
    tpu.vector_store %arg6[%c0_29, %c0_30], %140 {strides = array<i32>} : memref<4x8xf32, #tpu.memory_space<vmem>>, vector<4x8xf32>,
    %c0_31 = arith.constant 0 : index
    %c0_32 = arith.constant 0 : index
    %156 = vector.load %arg7[%c0_31, %c0_32] : memref<1x8xf32, #tpu.memory_space<vmem>>, vector<1x8xf32>
    tpu.vector_store %arg7[%c0_31, %c0_32], %154 {strides = array<i32>} : memref<1x8xf32, #tpu.memory_space<vmem>>, vector<1x8xf32>,
    return
  }
  func.func @transform_0(%arg0: i32) -> (i32, i32) {
    %c0_i32 = arith.constant 0 : i32
    %c0_i32_0 = arith.constant 0 : i32
    return %c0_i32, %arg0 : i32, i32
  }
  func.func @transform_1(%arg0: i32) -> (i32, i32) {
    %c0_i32 = arith.constant 0 : i32
    %c0_i32_0 = arith.constant 0 : i32
    %c0_i32_1 = arith.constant 0 : i32
    return %c0_i32, %c0_i32_0 : i32, i32
  }
  func.func @transform_2(%arg0: i32) -> (i32, i32) {
    %c0_i32 = arith.constant 0 : i32
    %c0_i32_0 = arith.constant 0 : i32
    %c0_i32_1 = arith.constant 0 : i32
    return %c0_i32, %c0_i32_0 : i32, i32
  }
  func.func @transform_3(%arg0: i32) -> (i32, i32) {
    %c0_i32 = arith.constant 0 : i32
    %c0_i32_0 = arith.constant 0 : i32
    %c0_i32_1 = arith.constant 0 : i32
    return %c0_i32, %c0_i32_0 : i32, i32
  }
  func.func @transform_4(%arg0: i32) -> (i32, i32) {
    %c0_i32 = arith.constant 0 : i32
    %c0_i32_0 = arith.constant 0 : i32
    %c0_i32_1 = arith.constant 0 : i32
    return %c0_i32, %c0_i32_0 : i32, i32
  }
  func.func @transform_5(%arg0: i32) -> (i32, i32) {
    %c0_i32 = arith.constant 0 : i32
    %c0_i32_0 = arith.constant 0 : i32
    return %c0_i32, %arg0 : i32, i32
  }
  func.func @transform_6(%arg0: i32) -> (i32, i32) {
    %c0_i32 = arith.constant 0 : i32
    %c0_i32_0 = arith.constant 0 : i32
    return %c0_i32, %arg0 : i32, i32
  }
}

</mosaic_0001>

<bundles_post_ra>
// kernel: tpu_custom_call.1
= control target key start
LH: loop header
LB: loop body
LE: loop exit
PB: predicated region body
PF: predicated region fallthrough
CT: control target
= control target key end

     0   :  { %12 = vsyncpa [#allocation3], 0  ;;  %s623_s0 = inlined_call_operand.hbm [shape: f32[4,8], index: 0, kind: input, shape index: {}]   ;;  %s624_s1 = inlined_call_operand.hbm [shape: f32[4,6], index: 1, kind: input, shape index: {}]   ;;  %s625_s2 = inlined_call_operand.vmem [shape: f32[4,6], index: 2, kind: input, shape index: {}]   ;;  %s626_s3 = inlined_call_operand.vmem [shape: f32[1,6], index: 3, kind: input, shape index: {}]   ;;  %s627_s4 = inlined_call_operand.vmem [shape: f32[1,6], index: 4, kind: input, shape index: {}]   ;;  %s628_s5 = inlined_call_operand.hbm [shape: f32[4,8], index: 5, kind: output, shape index: {0}]   ;;  %s629_s6 = inlined_call_operand.hbm [shape: f32[1,8], index: 6, kind: output, shape index: {1}]  }
   0x1   :  { %13 = vsyncpa [#allocation6], 0 }
   0x2   :  { %14 = vsyncpa [#allocation4], 0 }
   0x3   :  { %15 = vsyncpa [#allocation9], 0  ;;  %s485_s21 = smov [#allocation2]   ;;  %s486_s23 = smov [#allocation5]  }
   0x4   :  { %s22_s22 = sshll.u32 %s485_s21, 4  ;;  %s32_s24 = sshll.u32 %s486_s23, 4  ;;  %s23_s22 = int_to_ptr.vmem [resolvable:$true] %s22_s22  ;;  %s33_s24 = int_to_ptr.vmem [resolvable:$true] %s32_s24 }
   0x5   :  { %s389_s27 = scalar_lea.hbm %s623_s0, 64 }
   0x6   :  { %p390_p0 = scmp.ne.s32.totalorder %s623_s0, %s389_s27  ;;  %p393_p1 = scmp.lt.u32.totalorder %s389_s27, %s623_s0 }
   0x8   :  { %p395_p2 = pnand %p393_p1, %p390_p0 }
   0xa   :  { %398 = shalt.err (!%p395_p2)
}
   0xb   :  { %s399_s8 = scalar_lea.vmem %s23_s22, 64  ;;  %p404_p4 = scmp.lt.s32.totalorder %s23_s22, %s23_s22 }
   0xc   :  { %p400_p3 = scmp.ne.s32.totalorder %s23_s22, %s399_s8  ;;  %p405_p5 = scmp.lt.s32.totalorder %s399_s8, %s399_s8 }
   0xe   :  { %p406_p6 = por %p405_p5, %p404_p4 }
  0x10   :  { %p407_p7 = pnand %p406_p6, %p400_p3 }
  0x12   :  { %410 = shalt.err (!%p407_p7)
}
  0x13   :  { %25 = dma.hbm_to_vmem [thread:$0]  %s623_s0, 64, %s23_s22, [#allocation3]  }
  0x14   :  { %s411_s13 = scalar_lea.hbm %s624_s1, 64 }
  0x15   :  { %p412_p8 = scmp.ne.s32.totalorder %s624_s1, %s411_s13  ;;  %p415_p9 = scmp.lt.u32.totalorder %s411_s13, %s624_s1 }
  0x17   :  { %p417_p10 = pnand %p415_p9, %p412_p8 }
  0x19   :  { %420 = shalt.err (!%p417_p10)
}
  0x1a   :  { %s421_s18 = scalar_lea.vmem %s33_s24, 64  ;;  %p426_p12 = scmp.lt.s32.totalorder %s33_s24, %s33_s24 }
  0x1b   :  { %p422_p11 = scmp.ne.s32.totalorder %s33_s24, %s421_s18  ;;  %p427_p13 = scmp.lt.s32.totalorder %s421_s18, %s421_s18 }
  0x1d   :  { %p428_p0 = por %p427_p13, %p426_p12 }
  0x1f   :  { %p429_p1 = pnand %p428_p0, %p422_p11 }
  0x21   :  { %432 = shalt.err (!%p429_p1)
}
  0x22   :  { %35 = dma.hbm_to_vmem [thread:$0]  %s624_s1, 64, %s33_s24, [#allocation6]  }
  0x23   :  { %477 = dma.done.wait [#allocation3], 64  }
  0x24   :  { %478 = vsyncadd [#allocation3], 4294967232 }
  0x25   :  { %479 = dma.done.wait [#allocation6], 64  }
  0x26   :  { %480 = vsyncadd [#allocation6], 4294967232  ;;  %v487_v0 = vmov 0   ;;  %v50_v1 = vld [vmem:[%s625_s2] sm:$0xf]  ;;  %v488_v4 = vmov 1   ;;  %v72_v14 = vlaneseq }
  0x27   :  { %357 = vset.pattern.permute.xlu1 %v487_v0  ;;  %356 = vset.pattern.permute.xlu0 %v487_v0  ;;  %v49_v2 = vld [vmem:[#allocation5] sm:$0xf]  ;;  %v51_v3 = vld [vmem:[%s626_s3] sm:$0x1]  ;;  %v489_v5 = vmov 2   ;;  %v490_v6 = vmov 3  }
  0x28   :  { %80 = vperm.xlu1 %357, %v50_v1   ;;  %55 = vperm.xlu0 %356, %v49_v2   ;;  %v491_v7 = vmov 4   ;;  %v492_v8 = vmov 5   ;;  %v52_v9 = vld [vmem:[%s627_s4] sm:$0x1]  ;;  %vm59_vm0 = vcmask 60416   ;;  %v73_v19 = vshrl.u32 %v72_v14, 7 }
  0x29   :  { %v48_v10 = vld [vmem:[#allocation2] sm:$0xf]  ;;  %s493_s3 = smov [#allocation7]  }
  0x2a   :  { %v564_v23 = vsub.s32 0, %v73_v19  ;;  %s322_s4 = sshll.u32 %s493_s3, 4  ;;  %s323_s4 = int_to_ptr.vmem [resolvable:$true] %s322_s4 }
  0x2b   :  { %s433_s24 = scalar_lea.vmem %s323_s4, 64  ;;  %p438_p3 = scmp.lt.s32.totalorder %s323_s4, %s323_s4 }
  0x2c   :  { %358 = vset.pattern.permute.xlu1 %v488_v4  ;;  %69 = vperm.xlu0 %356, %v51_v3   ;;  %p434_p2 = scmp.ne.s32.totalorder %s323_s4, %s433_s24  ;;  %p439_p4 = scmp.lt.s32.totalorder %s433_s24, %s433_s24 }
  0x2d   :  { %100 = vperm.xlu1 %358, %v49_v2  }
  0x2e   :  { %p440_p5 = por %p439_p4, %p438_p3 }
  0x30   :  { %359 = vset.pattern.permute.xlu0 %v488_v4  ;;  %p441_p6 = pnand %p440_p5, %p434_p2 }
  0x31   :  { %122 = vperm.xlu1 %358, %v50_v1   ;;  %112 = vperm.xlu0 %359, %v51_v3  }
  0x35   :  { %360 = vset.pattern.permute.xlu1 %v489_v5  ;;  %361 = vset.pattern.permute.xlu0 %v489_v5 }
  0x36   :  { %142 = vperm.xlu1 %360, %v49_v2   ;;  %154 = vperm.xlu0 %361, %v51_v3  }
  0x3a   :  { %164 = vperm.xlu1 %360, %v50_v1   ;;  %363 = vset.pattern.permute.xlu0 %v490_v6 }
  0x3b   :  { %196 = vperm.xlu0 %363, %v51_v3  }
  0x3e   :  { %362 = vset.pattern.permute.xlu1 %v490_v6 }
  0x3f   :  { %184 = vperm.xlu1 %362, %v49_v2   ;;  %365 = vset.pattern.permute.xlu0 %v491_v7 }
  0x40   :  { %238 = vperm.xlu0 %365, %v51_v3  }
  0x43   :  { %206 = vperm.xlu1 %362, %v50_v1  }
  0x44   :  { %367 = vset.pattern.permute.xlu0 %v492_v8 }
  0x45   :  { %280 = vperm.xlu0 %367, %v51_v3  }
  0x47   :  { %364 = vset.pattern.permute.xlu1 %v491_v7 }
  0x48   :  { %226 = vperm.xlu1 %364, %v49_v2  }
  0x49   :  { %370 = vset.pattern.permute.xlu0 %v489_v5 }
  0x4a   :  { %172 = vperm.xlu0 %370, %v52_v9  }
  0x4c   :  { %248 = vperm.xlu1 %364, %v50_v1  }
  0x4e   :  { %373 = vset.pattern.permute.xlu0 %v492_v8 }
  0x4f   :  { %298 = vperm.xlu0 %373, %v52_v9  }
  0x50   :  { %366 = vset.pattern.permute.xlu1 %v492_v8 }
  0x51   :  { %268 = vperm.xlu1 %366, %v49_v2  }
  0x55   :  { %368 = vset.pattern.permute.xlu1 %v487_v0 }
  0x56   :  { %89 = vperm.xlu1 %368, %v52_v9  }
  0x5a   :  { %369 = vset.pattern.permute.xlu1 %v488_v4 }
  0x5b   :  { %130 = vperm.xlu1 %369, %v52_v9  }
  0x5f   :  { %371 = vset.pattern.permute.xlu1 %v490_v6 }
  0x60   :  { %214 = vperm.xlu1 %371, %v52_v9  }
  0x64   :  { %372 = vset.pattern.permute.xlu1 %v491_v7 }
  0x65   :  { %256 = vperm.xlu1 %372, %v52_v9  }
  0x69   :  { %374 = vset.pattern.permute.xlu1 %v492_v8 }
  0x6a   :  { %290 = vperm.xlu1 %374, %v50_v1  }
  0xa7   :  { %v56_v11 = vpop.permute.xlu0 %55  ;;  %v81_v12 = vpop.permute.xlu1 %80 }
  0xa8   :  { %v58_v13 = vmul.f32 %v56_v11, %v48_v10 }
  0xaa   :  { %v60_v15 = vsel %vm59_vm0, %v58_v13, 0.0 }
  0xab   :  { %v61_v16 = vrot.slane %v60_v15, 4  ;;  %v70_v24 = vpop.permute.xlu0 %69 }
  0xac   :  { %v101_v17 = vpop.permute.xlu1 %100  ;;  %v75_v27 = vrot.slane %v70_v24, %v564_v23 }
  0xad   :  { %v62_v18 = vadd.f32 %v61_v16, %v60_v15 }
  0xaf   :  { %v63_v20 = vrot.slane %v62_v18, 2 }
  0xb0   :  { %v123_v21 = vpop.permute.xlu1 %122  ;;  %v113_v44 = vpop.permute.xlu0 %112 }
  0xb1   :  { %v64_v22 = vadd.f32 %v63_v20, %v62_v18  ;;  %v118_v48 = vrot.slane %v113_v44, %v564_v23 }
  0xb3   :  { %v65_v25 = vrot.slane %v64_v22, 1 }
  0xb5   :  { %v66_v26 = vadd.f32 %v65_v25, %v64_v22  ;;  %v143_v28 = vpop.permute.xlu1 %142  ;;  %v155_v1 = vpop.permute.xlu0 %154 }
  0xb6   :  { %v160_v13 = vrot.slane %v155_v1, %v564_v23 }
  0xb7   :  { %v76_v29 = vadd.f32 %v75_v27, %v66_v26 }
  0xb9   :  { %375 = vtanh.f32 %v76_v29  ;;  %v165_v30 = vpop.permute.xlu1 %164 }
  0xbe   :  { %v185_v31 = vpop.permute.xlu1 %184 }
  0xc2   :  { %v567_v32 = vpop.permute.xlu1 %206 }
  0xc3   :  { %v376_v33 = vpop.eup %375 }
  0xc4   :  { %v83_v34 = vmul.f32 %v376_v33, %v81_v12  ;;  %v85_v46 = vmul.f32 %v376_v33, %v376_v33 }
  0xc6   :  { %v84_v35 = vadd.f32 %v83_v34, %v48_v10  ;;  %v86_v51 = vsub.f32 1.0, %v85_v46  ;;  %v197_v10 = vpop.permute.xlu0 %196 }
  0xc7   :  { %v569_v36 = vpop.permute.xlu1 %226 }
  0xc8   :  { %v103_v37 = vmul.f32 %v101_v17, %v84_v35 }
  0xca   :  { %v104_v38 = vsel %vm59_vm0, %v103_v37, 0.0  ;;  %v239_v15 = vpop.permute.xlu0 %238 }
  0xcb   :  { %v105_v39 = vrot.slane %v104_v38, 4  ;;  %v572_v40 = vpop.permute.xlu1 %248 }
  0xcd   :  { %v106_v41 = vadd.f32 %v105_v39, %v104_v38 }
  0xce   :  { %v581_v17 = vpop.permute.xlu0 %280 }
  0xcf   :  { %v107_v42 = vrot.slane %v106_v41, 2 }
  0xd0   :  { %v574_v43 = vpop.permute.xlu1 %268 }
  0xd1   :  { %v108_v45 = vadd.f32 %v107_v42, %v106_v41  ;;  %v202_v42 = vrot.slane %v197_v10, %v564_v23 }
  0xd2   :  { %v173_v18 = vpop.permute.xlu0 %172 }
  0xd3   :  { %v109_v47 = vrot.slane %v108_v45, 1  ;;  %v178_v22 = vrot.slane %v173_v18, %v564_v23 }
  0xd5   :  { %v110_v49 = vadd.f32 %v109_v47, %v108_v45  ;;  %v90_v50 = vpop.permute.xlu1 %89 }
  0xd6   :  { %v95_v52 = vrot.slane %v90_v50, %v564_v23 }
  0xd7   :  { %v119_v53 = vadd.f32 %v118_v48, %v110_v49 }
  0xd8   :  { %v96_v54 = vmul.f32 %v95_v52, %v86_v51 }
  0xd9   :  { %377 = vtanh.f32 %v119_v53 }
  0xda   :  { %v131_v55 = vpop.permute.xlu1 %130  ;;  %v97_v62 = vadd.f32 1.0, %v96_v54 }
  0xdb   :  { %v136_v59 = vrot.slane %v131_v55, %v564_v23 }
  0xdc   :  { %v98_v5 = vand.u32 2147483647, %v97_v62 }
  0xdf   :  { %v215_v45 = vpop.permute.xlu1 %214 }
  0xe0   :  { %v220_v48 = vrot.slane %v215_v45, %v564_v23 }
  0xe3   :  { %v378_v56 = vpop.eup %377 }
  0xe4   :  { %v125_v57 = vmul.f32 %v378_v56, %v123_v21  ;;  %v127_v58 = vmul.f32 %v378_v56, %v378_v56 }
  0xe6   :  { %v128_v60 = vsub.f32 1.0, %v127_v58  ;;  %v126_v61 = vadd.f32 %v125_v57, %v84_v35 }
  0xe8   :  { %v137_v63 = vmul.f32 %v136_v59, %v128_v60  ;;  %v145_v0 = vmul.f32 %v143_v28, %v126_v61 }
  0xea   :  { %v138_v2 = vadd.f32 1.0, %v137_v63  ;;  %v146_v3 = vsel %vm59_vm0, %v145_v0, 0.0  ;;  %v257_v0 = vpop.permute.xlu1 %256 }
  0xeb   :  { %v147_v4 = vrot.slane %v146_v3, 4 }
  0xec   :  { %v139_v6 = vand.u32 2147483647, %v138_v2 }
  0xed   :  { %v148_v7 = vadd.f32 %v147_v4, %v146_v3  ;;  %v262_v3 = vrot.slane %v257_v0, %v564_v23 }
  0xee   :  { %v140_v8 = vmul.f32 %v139_v6, %v98_v5 }
  0xef   :  { %v149_v9 = vrot.slane %v148_v7, 2 }
  0xf1   :  { %v150_v11 = vadd.f32 %v149_v9, %v148_v7 }
  0xf3   :  { %v151_v12 = vrot.slane %v150_v11, 1 }
  0xf5   :  { %v152_v14 = vadd.f32 %v151_v12, %v150_v11 }
  0xf7   :  { %v161_v16 = vadd.f32 %v160_v13, %v152_v14 }
  0xf9   :  { %379 = vtanh.f32 %v161_v16 }
 0x103   :  { %v380_v19 = vpop.eup %379 }
 0x104   :  { %v167_v20 = vmul.f32 %v380_v19, %v165_v30  ;;  %v169_v21 = vmul.f32 %v380_v19, %v380_v19 }
 0x106   :  { %v168_v24 = vadd.f32 %v167_v20, %v126_v61  ;;  %v170_v25 = vsub.f32 1.0, %v169_v21  ;;  %v291_v20 = vpop.permute.xlu1 %290  ;;  %v299_v21 = vpop.permute.xlu0 %298 }
 0x108   :  { %v187_v26 = vmul.f32 %v185_v31, %v168_v24  ;;  %v179_v27 = vmul.f32 %v178_v22, %v170_v25  ;;  %v304_v25 = vrot.slane %v299_v21, %v564_v23 }
 0x10a   :  { %v188_v28 = vsel %vm59_vm0, %v187_v26, 0.0  ;;  %v180_v29 = vadd.f32 1.0, %v179_v27 }
 0x10b   :  { %v189_v33 = vrot.slane %v188_v28, 4 }
 0x10c   :  { %v181_v34 = vand.u32 2147483647, %v180_v29 }
 0x10d   :  { %v190_v35 = vadd.f32 %v189_v33, %v188_v28 }
 0x10e   :  { %v182_v37 = vmul.f32 %v181_v34, %v140_v8 }
 0x10f   :  { %v191_v38 = vrot.slane %v190_v35, 2 }
 0x111   :  { %v192_v39 = vadd.f32 %v191_v38, %v190_v35 }
 0x113   :  { %v193_v41 = vrot.slane %v192_v39, 1 }
 0x115   :  { %v194_v30 = vadd.f32 %v193_v41, %v192_v39 }
 0x117   :  { %v203_v44 = vadd.f32 %v202_v42, %v194_v30 }
 0x119   :  { %381 = vtanh.f32 %v203_v44 }
 0x123   :  { %v382_v46 = vpop.eup %381 }
 0x124   :  { %v209_v31 = vmul.f32 %v382_v46, %v567_v32  ;;  %v211_v47 = vmul.f32 %v382_v46, %v382_v46  ;;  %v244_v32 = vrot.slane %v239_v15, %v564_v23 }
 0x126   :  { %v210_v49 = vadd.f32 %v209_v31, %v168_v24  ;;  %v212_v50 = vsub.f32 1.0, %v211_v47 }
 0x128   :  { %v229_v51 = vmul.f32 %v569_v36, %v210_v49  ;;  %v221_v52 = vmul.f32 %v220_v48, %v212_v50 }
 0x12a   :  { %v230_v53 = vsel %vm59_vm0, %v229_v51, 0.0  ;;  %v222_v54 = vadd.f32 1.0, %v221_v52 }
 0x12b   :  { %v231_v55 = vrot.slane %v230_v53, 4 }
 0x12c   :  { %v223_v56 = vand.u32 2147483647, %v222_v54 }
 0x12d   :  { %v232_v57 = vadd.f32 %v231_v55, %v230_v53 }
 0x12e   :  { %v224_v58 = vmul.f32 %v223_v56, %v182_v37 }
 0x12f   :  { %v233_v59 = vrot.slane %v232_v57, 2 }
 0x131   :  { %v234_v60 = vadd.f32 %v233_v59, %v232_v57 }
 0x133   :  { %v235_v61 = vrot.slane %v234_v60, 1 }
 0x135   :  { %v236_v62 = vadd.f32 %v235_v61, %v234_v60 }
 0x137   :  { %v245_v63 = vadd.f32 %v244_v32, %v236_v62 }
 0x139   :  { %383 = vtanh.f32 %v245_v63 }
 0x143   :  { %v384_v1 = vpop.eup %383 }
 0x144   :  { %v251_v36 = vmul.f32 %v384_v1, %v572_v40  ;;  %v253_v2 = vmul.f32 %v384_v1, %v384_v1  ;;  %v286_v40 = vrot.slane %v581_v17, %v564_v23 }
 0x146   :  { %v252_v4 = vadd.f32 %v251_v36, %v210_v49  ;;  %v254_v5 = vsub.f32 1.0, %v253_v2 }
 0x148   :  { %v271_v6 = vmul.f32 %v574_v43, %v252_v4  ;;  %v263_v7 = vmul.f32 %v262_v3, %v254_v5 }
 0x14a   :  { %v272_v8 = vsel %vm59_vm0, %v271_v6, 0.0  ;;  %v264_v9 = vadd.f32 1.0, %v263_v7 }
 0x14b   :  { %v273_v10 = vrot.slane %v272_v8, 4 }
 0x14c   :  { %v265_v11 = vand.u32 2147483647, %v264_v9 }
 0x14d   :  { %v274_v12 = vadd.f32 %v273_v10, %v272_v8 }
 0x14e   :  { %v266_v13 = vmul.f32 %v265_v11, %v224_v58 }
 0x14f   :  { %v275_v14 = vrot.slane %v274_v12, 2 }
 0x151   :  { %v276_v15 = vadd.f32 %v275_v14, %v274_v12 }
 0x153   :  { %v277_v16 = vrot.slane %v276_v15, 1 }
 0x155   :  { %v278_v18 = vadd.f32 %v277_v16, %v276_v15 }
 0x157   :  { %v287_v19 = vadd.f32 %v286_v40, %v278_v18 }
 0x159   :  { %385 = vtanh.f32 %v287_v19 }
 0x163   :  { %v386_v43 = vpop.eup %385 }
 0x164   :  { %v293_v22 = vmul.f32 %v386_v43, %v291_v20  ;;  %v295_v24 = vmul.f32 %v386_v43, %v386_v43 }
 0x166   :  { %v294_v26 = vadd.f32 %v293_v22, %v252_v4  ;;  %v296_v27 = vsub.f32 1.0, %v295_v24 }
 0x168   :  { %313 = vst.msk [vmem:[#allocation7] sm:$0xf] %vm59_vm0, %v294_v26  ;;  %v305_v28 = vmul.f32 %v304_v25, %v296_v27 }
 0x169   :  { %444 = shalt.err (!%p441_p6)
}
 0x16a   :  { %s445_s27 = scalar_lea.hbm %s628_s5, 64 }
 0x16b   :  { %p446_p7 = scmp.ne.s32.totalorder %s628_s5, %s445_s27  ;;  %p449_p8 = scmp.lt.u32.totalorder %s445_s27, %s628_s5 }
 0x16d   :  { %p451_p9 = pnand %p449_p8, %p446_p7 }
 0x16f   :  { %454 = shalt.err (!%p451_p9)
}
 0x170   :  { %325 = dma.vmem_to_hbm [thread:$0]  %s323_s4, 64, %s628_s5, [#allocation4]   ;;  %v306_v23 = vadd.f32 1.0, %v305_v28  ;;  %vm314_vm1 = vcmask 57344  }
 0x171   :  { %s494_s10 = smov [#allocation8]  }
 0x172   :  { %v307_v17 = vand.u32 2147483647, %v306_v23  ;;  %s332_s11 = sshll.u32 %s494_s10, 4  ;;  %s333_s11 = int_to_ptr.vmem [resolvable:$true] %s332_s11 }
 0x173   :  { %s455_s12 = scalar_lea.vmem %s333_s11, 16  ;;  %s459_s13 = scalar_lea.vmem %s333_s11, 32 }
 0x174   :  { %v308_v29 = vmul.f32 %v307_v17, %v266_v13  ;;  %p456_p10 = scmp.ne.s32.totalorder %s333_s11, %s455_s12  ;;  %p460_p11 = scmp.lt.s32.totalorder %s333_s11, %s333_s11 }
 0x175   :  { %p461_p12 = scmp.lt.s32.totalorder %s459_s13, %s455_s12 }
 0x176   :  { %v309_v33 = vadd.f32 1e-08, %v308_v29 }
 0x177   :  { %p462_p13 = por %p461_p12, %p460_p11 }
 0x178   :  { %387 = vlog2.f32 %v309_v33 }
 0x179   :  { %p463_p0 = pnand %p462_p13, %p456_p10 }
 0x182   :  { %v388_v34 = vpop.eup %387 }
 0x183   :  { %v311_v35 = vmul.f32 0.6931472, %v388_v34 }
 0x185   :  { %315 = vst.msk [vmem:[#allocation8] sm:$0x1] %vm314_vm1, %v311_v35 }
 0x186   :  { %466 = shalt.err (!%p463_p0)
}
 0x187   :  { %s467_s15 = scalar_lea.hbm %s629_s6, 16 }
 0x188   :  { %p468_p1 = scmp.ne.s32.totalorder %s629_s6, %s467_s15  ;;  %p471_p2 = scmp.lt.u32.totalorder %s467_s15, %s629_s6 }
 0x18a   :  { %p473_p3 = pnand %p471_p2, %p468_p1 }
 0x18c   :  { %476 = shalt.err (!%p473_p3)
}
 0x18d   :  { %335 = dma.vmem_to_hbm [thread:$0]  %s333_s11, 16, %s629_s6, [#allocation9]  }
 0x18e   :  { %481 = dma.done.wait [#allocation4], 64  }
 0x18f   :  { %482 = vsyncadd [#allocation4], 4294967232 }
 0x190   :  { %483 = dma.done.wait [#allocation9], 16  }
 0x191   :  { %484 = vsyncadd [#allocation9], 4294967280 }
 0x192   :  { %342 = vsyncpa [#allocation3], 1 }
 0x193   :  { %343 = vsyncpa [#allocation6], 1 }
 0x194   :  { %344 = vsyncpa [#allocation4], 1 }
 0x195   :  { %345 = vsyncpa [#allocation9], 1 }

</bundles_post_ra>
